<compile_context>
chip_gen: v7x
topology: tpu7x:2x2x1
jax: 0.10.0
libtpu: 0.0.40
codegen_flags: <defaults>
</compile_context>

<pallas_src>
import jax
import jax.numpy as jnp
from jax.experimental import pallas as pl
from jax.experimental.pallas import tpu as pltpu

LANE = 128          # TPU lane width: classifier output padded to a full lane tile.
NEG_MASK = -1e30    # large finite negative for padded logit lanes (avoids -inf arithmetic)


def _round_up(x: int, m: int) -> int:
    return (x + m - 1) // m * m


def _mlp_softmax_kernel(x_ref, w1_ref, b1_ref, w2_ref, b2_ref, o_ref):
    # x_ref:  (TB, F)    input dtype (f32/bf16) -> cast to bf16 in VMEM
    # w1_ref: (F, F)     bf16   (resident across all grid steps)
    # b1_ref: (1, F)     f32
    # w2_ref: (F, LANE)  bf16   (zero-padded columns)
    # b2_ref: (1, LANE)  f32    (padded lanes hold -1e30 -> act as softmax mask)
    # o_ref:  (TB, LANE) f32    (lane-dense output; wrapper slices to n_out)
    x = x_ref[...].astype(jnp.bfloat16)

    # Layer 1: Linear + ReLU (MXU bf16 matmul, f32 accumulation).
    h = jnp.dot(x, w1_ref[...], preferred_element_type=jnp.float32)
    h = jnp.maximum(h + b1_ref[...], 0.0)

    # Layer 2: Linear into a lane-dense 128-wide logits tile; padded lanes get -1e30
    # directly from the bias (zero weight columns), so no extra masking is needed.
    logits = jnp.dot(h.astype(jnp.bfloat16), w2_ref[...],
                     preferred_element_type=jnp.float32)
    logits = logits + b2_ref[...]

    # Numerically stable softmax; padded lanes contribute exp(-1e30 - m) == 0.
    m = jnp.max(logits, axis=-1, keepdims=True)
    e = jnp.exp(logits - m)
    denom = jnp.sum(e, axis=-1, keepdims=True)
    o_ref[...] = (e / denom).astype(o_ref.dtype)   # exact division (row sums == 1)


def prepare_params(w1, b1, w2, b2):
    """One-time weight preprocessing (hoisted out of the per-call path).

    w1: (F, F) with layout (in, out); b1: (F,); w2: (F, n_out); b2: (n_out,).
    Returns bf16 weights, f32 biases, with W2/b2 padded to 128 output lanes and the
    padded bias lanes set to -1e30 so they vanish under softmax.
    """
    F = w1.shape[0]
    n_out = w2.shape[1]
    assert n_out <= LANE
    w1_bf = w1.astype(jnp.bfloat16)
    w2_pad = jnp.pad(w2.astype(jnp.float32), ((0, 0), (0, LANE - n_out))).astype(jnp.bfloat16)
    b1_2d = b1.reshape(1, F).astype(jnp.float32)
    b2_pad = jnp.full((1, LANE), NEG_MASK, jnp.float32)
    b2_pad = b2_pad.at[0, :n_out].set(b2.astype(jnp.float32))
    return (w1_bf, b1_2d, w2_pad, b2_pad, n_out)


def mlp_forward(x, params, *, block_b: int = 512):
    """x: (B, C, S, S). params: output of prepare_params. Returns softmax probs (B, n_out)."""
    w1_bf, b1_2d, w2_pad, b2_pad, n_out = params
    B = x.shape[0]
    F = w1_bf.shape[0]

    # nn.Flatten(start_dim=1); keep input dtype (cast to bf16 happens inside the kernel).
    x_flat = x.reshape(B, -1)
    assert x_flat.shape[1] == F
    x_itemsize = jnp.dtype(x_flat.dtype).itemsize

    # Batch tile selection:
    #   * multiples of 16 (native bf16 sublane tile), as large as block_b allows;
    #   * tiny B uses a single full-extent block;
    #   * ensure >= 2 grid steps when B >= 32 so v7x's second TensorCore gets work.
    if B <= 16:
        tb = B
    else:
        tb = min(block_b, (B // 16) * 16)
        if pl.cdiv(B, tb) == 1 and B >= 32:
            tb = max(16, _round_up(pl.cdiv(B, 2), 16))
    grid = (pl.cdiv(B, tb),)   # ragged tail handled by masked partial-block writes

    # --- VMEM budget (generation-aware) --------------------------------------
    w1_bytes = F * F * 2
    w2_bytes = F * LANE * 2
    bias_bytes = (F + LANE) * 4
    # Single-buffer the constant-index weight operands once double-buffering them
    # would waste meaningful VMEM (only matters at large F).
    single_buffer_weights = 2 * (w1_bytes + w2_bytes) > (8 << 20)
    wbuf = 1 if single_buffer_weights else 2
    tiles = 2 * tb * F * x_itemsize + 2 * tb * LANE * 4            # double-buffered x / out
    scratch = tb * F * 4 + tb * F * 2 + tb * LANE * 4              # h f32 + h bf16 + logits
    needed = wbuf * (w1_bytes + w2_bytes) + 2 * bias_bytes + tiles + scratch
    try:
        vmem_cap = getattr(pltpu.get_tpu_info(), "vmem_capacity_bytes", 64 << 20)
    except Exception:
        vmem_cap = 64 << 20                       # assume most restrictive gen (v7x)
    vmem_limit = int(min(max(int(needed * 1.5), 8 << 20), int(vmem_cap * 0.85)))

    cost = pl.CostEstimate(
        flops=2 * B * F * F + 2 * B * F * LANE,
        transcendentals=B * LANE,
        bytes_accessed=(B * F * x_itemsize + w1_bytes + w2_bytes + bias_bytes
                        + B * LANE * 4),
    )

    def wspec(shape):
        if single_buffer_weights:
            return pl.BlockSpec(shape, lambda i: (0, 0), pipeline_mode=pl.Buffered(1))
        return pl.BlockSpec(shape, lambda i: (0, 0))

    out_padded = pl.pallas_call(
        _mlp_softmax_kernel,
        out_shape=jax.ShapeDtypeStruct((B, LANE), jnp.float32),
        grid_spec=pltpu.PrefetchScalarGridSpec(
            num_scalar_prefetch=0,
            grid=grid,
            in_specs=[
                pl.BlockSpec((tb, F), lambda i: (i, 0)),   # x tile (pipelined)
                wspec((F, F)),                             # W1 (resident)
                wspec((1, F)),                             # b1
                wspec((F, LANE)),                          # W2 padded (resident)
                wspec((1, LANE)),                          # b2 padded (softmax mask folded in)
            ],
            out_specs=pl.BlockSpec((tb, LANE), lambda i: (i, 0)),
        ),
        compiler_params=pltpu.CompilerParams(
            dimension_semantics=("parallel",),
            vmem_limit_bytes=vmem_limit,
        ),
        cost_estimate=cost,
    )(x_flat, w1_bf, b1_2d, w2_pad, b2_pad)

    return out_padded[:, :n_out]


def init_params(key, space_length):
    """Deterministic parameter init matching the module's shapes.

    PyTorch nn.Linear stores weight as (out, in); we store the transpose (in, out)
    so the kernel computes x @ W without an in-kernel transpose.
    """
    f = space_length ** 2
    k1, k2, k3, k4 = jax.random.split(key, 4)
    bound1 = 1.0 / jnp.sqrt(f)
    w1 = jax.random.uniform(k1, (f, f), jnp.float32, -bound1, bound1)
    b1 = jax.random.uniform(k2, (f,), jnp.float32, -bound1, bound1)
    bound2 = 1.0 / jnp.sqrt(f)
    w2 = jax.random.uniform(k3, (f, 10), jnp.float32, -bound2, bound2)
    b2 = jax.random.uniform(k4, (10,), jnp.float32, -bound2, bound2)
    return w1, b1, w2, b2


if __name__ == "__main__":
    space_length = 16                      # F = 16**2 = 256
    B = 4
    key = jax.random.PRNGKey(0)
    kx, kp = jax.random.split(key)

    x = jax.random.normal(kx, (B, 1, space_length, space_length), jnp.float32)
    w1, b1, w2, b2 = init_params(kp, space_length)

    params = prepare_params(w1, b1, w2, b2)   # one-time weight preprocessing (hoisted)
    out = mlp_forward(x, params)
    out = jax.block_until_ready(out)

    # Reference with the same bf16 input/weight casts (f32 accumulation), plus a looser
    # check against the pure-f32 math.
    x_flat = x.reshape(B, -1)
    xb = x_flat.astype(jnp.bfloat16)
    h_ref = jnp.maximum(
        jnp.dot(xb, w1.astype(jnp.bfloat16), preferred_element_type=jnp.float32) + b1, 0.0)
    logits_ref = jnp.dot(h_ref.astype(jnp.bfloat16), w2.astype(jnp.bfloat16),
                         preferred_element_type=jnp.float32) + b2
    ref_bf16 = jax.nn.softmax(logits_ref, axis=1)

    h_f32 = jnp.maximum(x_flat @ w1 + b1, 0.0)
    ref_f32 = jax.nn.softmax(h_f32 @ w2 + b2, axis=1)

    assert out.shape == (B, 10)
    assert jnp.allclose(out, ref_bf16, atol=2e-3, rtol=2e-3)
    assert jnp.allclose(out, ref_f32, atol=3e-2, rtol=3e-2)
    assert jnp.allclose(jnp.sum(out, axis=1), 1.0, atol=1e-5)

    print("KERNEL_OK")
</pallas_src>

<mosaic_0001>
module attributes {stable_mosaic.version = 11 : i64} {
  func.func @_mlp_softmax_kernel(%arg0: i32, %arg1: memref<4x256xf32, #tpu.memory_space<vmem>>, %arg2: memref<256x256xbf16, #tpu.memory_space<vmem>>, %arg3: memref<1x256xf32, #tpu.memory_space<vmem>>, %arg4: memref<256x128xbf16, #tpu.memory_space<vmem>>, %arg5: memref<1x128xf32, #tpu.memory_space<vmem>>, %arg6: memref<4x128xf32, #tpu.memory_space<vmem>>) attributes {dimension_semantics = [#tpu.dimension_semantics<parallel>], iteration_bounds = array<i64: 1>, scalar_prefetch = 0 : i64, scratch_operands = 0 : i64, tpu.core_type = #tpu.core_type<tc>, window_params = [{transform_indices = @transform_0, window_bounds = array<i64: 4, 256>}, {pipeline_mode = #tpu.pipeline_mode<synchronous>, transform_indices = @transform_1, window_bounds = array<i64: 256, 256>}, {pipeline_mode = #tpu.pipeline_mode<synchronous>, transform_indices = @transform_2, window_bounds = array<i64: 1, 256>}, {pipeline_mode = #tpu.pipeline_mode<synchronous>, transform_indices = @transform_3, window_bounds = array<i64: 256, 128>}, {pipeline_mode = #tpu.pipeline_mode<synchronous>, transform_indices = @transform_4, window_bounds = array<i64: 1, 128>}, {transform_indices = @transform_5, window_bounds = array<i64: 4, 128>}]} {
    %c0 = arith.constant 0 : index
    %c0_0 = arith.constant 0 : index
    %0 = vector.load %arg1[%c0, %c0_0] : memref<4x256xf32, #tpu.memory_space<vmem>>, vector<4x256xf32>
    %1 = arith.truncf %0 : vector<4x256xf32> to vector<4x256xbf16>
    %c0_1 = arith.constant 0 : index
    %c0_2 = arith.constant 0 : index
    %2 = vector.load %arg2[%c0_1, %c0_2] : memref<256x256xbf16, #tpu.memory_space<vmem>>, vector<256x256xbf16>
    %cst = arith.constant dense<0.000000e+00> : vector<4x256xf32>
    %3 = tpu.matmul %1, %2, %cst {dimension_numbers = #tpu.dot_dimension_numbers<[1], [0], [0], [1], [0, 0, 1, 1], [], []>} : vector<4x256xbf16>, vector<256x256xbf16>, vector<4x256xf32> -> vector<4x256xf32>
    %c0_3 = arith.constant 0 : index
    %c0_4 = arith.constant 0 : index
    %4 = vector.load %arg3[%c0_3, %c0_4] : memref<1x256xf32, #tpu.memory_space<vmem>>, vector<1x256xf32>
    %5 = vector.broadcast %4 : vector<1x256xf32> to vector<4x256xf32>
    %6 = arith.addf %3, %5 : vector<4x256xf32>
    %cst_5 = arith.constant 0.000000e+00 : f32
    %7 = vector.broadcast %cst_5 : f32 to vector<4x256xf32>
    %8 = arith.maximumf %6, %7 : vector<4x256xf32>
    %9 = arith.truncf %8 : vector<4x256xf32> to vector<4x256xbf16>
    %c0_6 = arith.constant 0 : index
    %c0_7 = arith.constant 0 : index
    %10 = vector.load %arg4[%c0_6, %c0_7] : memref<256x128xbf16, #tpu.memory_space<vmem>>, vector<256x128xbf16>
    %cst_8 = arith.constant dense<0.000000e+00> : vector<4x128xf32>
    %11 = tpu.matmul %9, %10, %cst_8 {dimension_numbers = #tpu.dot_dimension_numbers<[1], [0], [0], [1], [0, 0, 1, 1], [], []>} : vector<4x256xbf16>, vector<256x128xbf16>, vector<4x128xf32> -> vector<4x128xf32>
    %c0_9 = arith.constant 0 : index
    %c0_10 = arith.constant 0 : index
    %12 = vector.load %arg5[%c0_9, %c0_10] : memref<1x128xf32, #tpu.memory_space<vmem>>, vector<1x128xf32>
    %13 = vector.broadcast %12 : vector<1x128xf32> to vector<4x128xf32>
    %14 = arith.addf %11, %13 : vector<4x128xf32>
    %cst_11 = arith.constant dense<0xFF800000> : vector<4xf32>
    %15 = vector.multi_reduction <maximumf>, %14, %cst_11 [1] : vector<4x128xf32> to vector<4xf32>
    %16 = vector.shape_cast %15 : vector<4xf32> to vector<4x1xf32>
    %17 = vector.broadcast %16 : vector<4x1xf32> to vector<4x128xf32>
    %18 = arith.subf %14, %17 : vector<4x128xf32>
    %19 = math.exp %18 : vector<4x128xf32>
    %cst_12 = arith.constant dense<0.000000e+00> : vector<4xf32>
    %20 = vector.multi_reduction <add>, %19, %cst_12 [1] : vector<4x128xf32> to vector<4xf32>
    %21 = vector.shape_cast %20 : vector<4xf32> to vector<4x1xf32>
    %22 = vector.broadcast %21 : vector<4x1xf32> to vector<4x128xf32>
    %23 = arith.divf %19, %22 : vector<4x128xf32>
    %c0_13 = arith.constant 0 : index
    %c0_14 = arith.constant 0 : index
    %24 = vector.load %arg6[%c0_13, %c0_14] : memref<4x128xf32, #tpu.memory_space<vmem>>, vector<4x128xf32>
    tpu.vector_store %arg6[%c0_13, %c0_14], %23 {strides = array<i32>} : memref<4x128xf32, #tpu.memory_space<vmem>>, vector<4x128xf32>,
    return
  }
  func.func @transform_0(%arg0: i32) -> (i32, i32) {
    %c0_i32 = arith.constant 0 : i32
    %c0_i32_0 = arith.constant 0 : i32
    return %arg0, %c0_i32 : i32, i32
  }
  func.func @transform_1(%arg0: i32) -> (i32, i32) {
    %c0_i32 = arith.constant 0 : i32
    %c0_i32_0 = arith.constant 0 : i32
    %c0_i32_1 = arith.constant 0 : i32
    return %c0_i32, %c0_i32_0 : i32, i32
  }
  func.func @transform_2(%arg0: i32) -> (i32, i32) {
    %c0_i32 = arith.constant 0 : i32
    %c0_i32_0 = arith.constant 0 : i32
    %c0_i32_1 = arith.constant 0 : i32
    return %c0_i32, %c0_i32_0 : i32, i32
  }
  func.func @transform_3(%arg0: i32) -> (i32, i32) {
    %c0_i32 = arith.constant 0 : i32
    %c0_i32_0 = arith.constant 0 : i32
    %c0_i32_1 = arith.constant 0 : i32
    return %c0_i32, %c0_i32_0 : i32, i32
  }
  func.func @transform_4(%arg0: i32) -> (i32, i32) {
    %c0_i32 = arith.constant 0 : i32
    %c0_i32_0 = arith.constant 0 : i32
    %c0_i32_1 = arith.constant 0 : i32
    return %c0_i32, %c0_i32_0 : i32, i32
  }
  func.func @transform_5(%arg0: i32) -> (i32, i32) {
    %c0_i32 = arith.constant 0 : i32
    %c0_i32_0 = arith.constant 0 : i32
    return %arg0, %c0_i32 : i32, i32
  }
}

</mosaic_0001>

<bundles_post_ra>
// kernel: tpu_custom_call.1
= control target key start
LH: loop header
LB: loop body
LE: loop exit
PB: predicated region body
PF: predicated region fallthrough
CT: control target
= control target key end

     0   :  { %10 = vsyncpa [#allocation3], 0  ;;  %s860_s0 = inlined_call_operand.hbm [shape: f32[4,256], index: 0, kind: input, shape index: {}]   ;;  %s861_s1 = inlined_call_operand.hbm [shape: bf16[256,256], index: 1, kind: input, shape index: {}]   ;;  %s862_s2 = inlined_call_operand.vmem [shape: f32[1,256], index: 2, kind: input, shape index: {}]   ;;  %s863_s3 = inlined_call_operand.hbm [shape: bf16[256,128], index: 3, kind: input, shape index: {}]   ;;  %s864_s4 = inlined_call_operand.vmem [shape: f32[1,128], index: 4, kind: input, shape index: {}]   ;;  %s865_s5 = inlined_call_operand.hbm [shape: f32[4,128], index: 5, kind: output, shape index: {}]  }
   0x1   :  { %11 = vsyncpa [#allocation6], 0 }
   0x2   :  { %12 = vsyncpa [#allocation4], 0  ;;  %s762_s18 = smov [#allocation5]   ;;  %s668_s22 = scalar_lea.hbm %s861_s1, 4096 }
   0x3   :  { %s28_s19 = sshll.u32 %s762_s18, 4  ;;  %p669_p0 = scmp.ne.s32.totalorder %s861_s1, %s668_s22  ;;  %s29_s19 = int_to_ptr.vmem [resolvable:$true] %s28_s19 }
   0x4   :  { %p672_p1 = scmp.lt.u32.totalorder %s668_s22, %s861_s1 }
   0x6   :  { %p674_p2 = pnand %p672_p1, %p669_p0 }
   0x8   :  { %677 = shalt.err (!%p674_p2)
}
   0x9   :  { %s678_s27 = scalar_lea.vmem %s29_s19, 4096  ;;  %p683_p4 = scmp.lt.s32.totalorder %s29_s19, %s29_s19 }
   0xa   :  { %p679_p3 = scmp.ne.s32.totalorder %s29_s19, %s678_s27  ;;  %p684_p5 = scmp.lt.s32.totalorder %s678_s27, %s678_s27 }
   0xc   :  { %p685_p6 = por %p684_p5, %p683_p4 }
   0xe   :  { %p686_p7 = pnand %p685_p6, %p679_p3 }
  0x10   :  { %689 = shalt.err (!%p686_p7)
}
  0x11   :  { %s763_s28 = smov 128   ;;  %s764_s29 = smov 8  }
  0x12   :  { %34 = dma.hbm_to_vmem [thread:$0]  %s861_s1, 4096, %s29_s19, [#allocation6], %s763_s28, %s763_s28, %s764_s29  }
  0x13   :  { %s765_s7 = smov [#allocation2]   ;;  %s766_s9 = smov [#allocation7]  }
  0x14   :  { %s19_s8 = sshll.u32 %s765_s7, 4  ;;  %s42_s10 = sshll.u32 %s766_s9, 4  ;;  %s20_s8 = int_to_ptr.vmem [resolvable:$true] %s19_s8  ;;  %s43_s10 = int_to_ptr.vmem [resolvable:$true] %s42_s10 }
  0x15   :  { %s690_s13 = scalar_lea.hbm %s860_s0, 128 }
  0x16   :  { %p691_p8 = scmp.ne.s32.totalorder %s860_s0, %s690_s13  ;;  %p694_p9 = scmp.lt.u32.totalorder %s690_s13, %s860_s0 }
  0x18   :  { %p696_p10 = pnand %p694_p9, %p691_p8 }
  0x1a   :  { %699 = shalt.err (!%p696_p10)
}
  0x1b   :  { %s700_s1 = scalar_lea.vmem %s20_s8, 128  ;;  %p705_p12 = scmp.lt.s32.totalorder %s20_s8, %s20_s8 }
  0x1c   :  { %p701_p11 = scmp.ne.s32.totalorder %s20_s8, %s700_s1  ;;  %p706_p13 = scmp.lt.s32.totalorder %s700_s1, %s700_s1 }
  0x1e   :  { %p707_p0 = por %p706_p13, %p705_p12 }
  0x20   :  { %p708_p1 = pnand %p707_p0, %p701_p11 }
  0x22   :  { %711 = shalt.err (!%p708_p1)
}
  0x23   :  { %22 = dma.hbm_to_vmem [thread:$0]  %s860_s0, 128, %s20_s8, [#allocation3]  }
  0x24   :  { %s712_s22 = scalar_lea.hbm %s863_s3, 2048 }
  0x25   :  { %p713_p2 = scmp.ne.s32.totalorder %s863_s3, %s712_s22  ;;  %p716_p3 = scmp.lt.u32.totalorder %s712_s22, %s863_s3 }
  0x27   :  { %p718_p4 = pnand %p716_p3, %p713_p2 }
  0x29   :  { %721 = shalt.err (!%p718_p4)
}
  0x2a   :  { %s722_s27 = scalar_lea.vmem %s43_s10, 2048  ;;  %p727_p6 = scmp.lt.s32.totalorder %s43_s10, %s43_s10 }
  0x2b   :  { %p723_p5 = scmp.ne.s32.totalorder %s43_s10, %s722_s27  ;;  %p728_p7 = scmp.lt.s32.totalorder %s722_s27, %s722_s27 }
  0x2d   :  { %p729_p8 = por %p728_p7, %p727_p6 }
  0x2f   :  { %p730_p9 = pnand %p729_p8, %p723_p5 }
  0x31   :  { %733 = shalt.err (!%p730_p9)
}
  0x32   :  { %s767_s0 = smov 64   ;;  %s768_s28 = smov 4  }
  0x33   :  { %48 = dma.hbm_to_vmem [thread:$0]  %s863_s3, 2048, %s43_s10, [#allocation6], %s767_s0, %s767_s0, %s768_s28  }
  0x34   :  { %756 = dma.done.wait [#allocation3], 128  }
  0x35   :  { %757 = vsyncadd [#allocation3], 4294967168 }
  0x36   :  { %758 = dma.done.wait [#allocation6], 6144  }
  0x37   :  { %759 = vsyncadd [#allocation6], 4294961152  ;;  %v599_v0 = vld [vmem:[#allocation5 + $0x4] ss:$8 sps:$4 sm:$0xff]   ;;  %v601_v1 = vld [vmem:[#allocation5] ss:$8 sps:$4 sm:$0xff]   ;;  %v101_v52 = vlaneseq }
  0x38   :  { %271 = vmatprep.subr.bf16.mxu0 %v599_v0  ;;  %v602_v2 = vld [vmem:[#allocation5 + $0x14] ss:$8 sps:$4 sm:$0xff]   ;;  %v604_v3 = vld [vmem:[#allocation5 + $0x10] ss:$8 sps:$4 sm:$0xff]   ;;  %v605_v4 = vld [vmem:[#allocation5 + $0x24] ss:$8 sps:$4 sm:$0xff]  }
  0x39   :  { %272 = vmatpush1.bf16.msra.mxu0 %v601_v1  ;;  %v607_v5 = vld [vmem:[#allocation5 + $0x20] ss:$8 sps:$4 sm:$0xff]   ;;  %v608_v6 = vld [vmem:[#allocation5 + $0x34] ss:$8 sps:$4 sm:$0xff]   ;;  %v610_v7 = vld [vmem:[#allocation5 + $0x30] ss:$8 sps:$4 sm:$0xff]  }
  0x3a   :  { %273 = vmatprep.subr.bf16.mxu0 %v602_v2  ;;  %v611_v8 = vld [vmem:[#allocation5 + $0x44] ss:$8 sps:$4 sm:$0xff]   ;;  %v613_v9 = vld [vmem:[#allocation5 + $0x40] ss:$8 sps:$4 sm:$0xff]   ;;  %v614_v10 = vld [vmem:[#allocation5 + $0x54] ss:$8 sps:$4 sm:$0xff]  }
  0x3b   :  { %v616_v11 = vld [vmem:[#allocation5 + $0x50] ss:$8 sps:$4 sm:$0xff]   ;;  %v617_v12 = vld [vmem:[#allocation5 + $0x64] ss:$8 sps:$4 sm:$0xff]   ;;  %v619_v13 = vld [vmem:[#allocation5 + $0x60] ss:$8 sps:$4 sm:$0xff]  }
  0x3c   :  { %v836_v14 = vld [vmem:[#allocation2] sm:$0xff]  ;;  %v648_v17 = vld [vmem:[#allocation7 + $0x40] sm:$0xff]   ;;  %v650_v20 = vld [vmem:[#allocation7 + $0x48] sm:$0xff]   ;;  %v102_v53 = vshrl.u32 %v101_v52, 7  ;;  %vm491_vm0 = vcmask 1043456  }
  0x3d   :  { %274 = vmatpush1.bf16.msra.mxu0 %v604_v3  ;;  %v620_v15 = vld [vmem:[#allocation5 + $0x74] ss:$8 sps:$4 sm:$0xff]   ;;  %v63_v16 = vcombine.high %v836_v14, %v836_v14  ;;  %v649_v18 = vld [vmem:[#allocation7] sm:$0xff]   ;;  %569 = vmatprep.subr.bf16.mxu1 %v648_v17  ;;  %v651_v21 = vld [vmem:[#allocation7 + $0x8] sm:$0xff]   ;;  %v65_v47 = vpack.c.bf16 %v836_v14, %v836_v14 }
  0x3e   :  { %275 = vmatprep.subr.bf16.mxu0 %v605_v4  ;;  %570 = vmatpush3.bf16.msra.mxu1 %v649_v18  ;;  %v652_v22 = vld [vmem:[#allocation7 + $0x50] sm:$0xff]   ;;  %v623_v24 = vld [vmem:[#allocation5 + $0x84] ss:$8 sps:$4 sm:$0xff]   ;;  %v654_v26 = vld [vmem:[#allocation7 + $0x58] sm:$0xff]   ;;  %v103_v54 = vsub.s32 0, %v102_v53  ;;  %v107_v56 = vsub.s32 1, %v102_v53 }
  0x3f   :  { %v66_v19 = vpack.c.bf16 %v63_v16, %v63_v16  ;;  %571 = vmatprep.subr.bf16.mxu1 %v650_v20  ;;  %v622_v23 = vld [vmem:[#allocation5 + $0x70] ss:$8 sps:$4 sm:$0xff]   ;;  %v625_v27 = vld [vmem:[#allocation5 + $0x80] ss:$8 sps:$4 sm:$0xff]   ;;  %v626_v28 = vld [vmem:[#allocation5 + $0x94] ss:$8 sps:$4 sm:$0xff]  }
  0x40   :  { %v653_v25 = vld [vmem:[#allocation7 + $0x10] sm:$0xff]   ;;  %v655_v30 = vld [vmem:[#allocation7 + $0x18] sm:$0xff]   ;;  %v656_v31 = vld [vmem:[#allocation7 + $0x60] sm:$0xff]  }
  0x41   :  { %276 = vmatpush1.bf16.msra.mxu0 %v607_v5  ;;  %303 = vmatprep.mubr.bf16.mxu0 %v66_v19  ;;  %v628_v29 = vld [vmem:[#allocation5 + $0x90] ss:$8 sps:$4 sm:$0xff]   ;;  %v629_v32 = vld [vmem:[#allocation5 + $0xa4] ss:$8 sps:$4 sm:$0xff]   ;;  %v631_v35 = vld [vmem:[#allocation5 + $0xa0] ss:$8 sps:$4 sm:$0xff]  }
  0x42   :  { %277 = vmatprep.subr.bf16.mxu0 %v608_v6  ;;  %572 = vmatpush3.bf16.msra.mxu1 %v651_v21  ;;  %v657_v33 = vld [vmem:[#allocation7 + $0x20] sm:$0xff]   ;;  %v658_v34 = vld [vmem:[#allocation7 + $0x68] sm:$0xff]   ;;  %v632_v36 = vld [vmem:[#allocation5 + $0xb4] ss:$8 sps:$4 sm:$0xff]  }
  0x43   :  { %573 = vmatprep.subr.bf16.mxu1 %v652_v22  ;;  %v659_v37 = vld [vmem:[#allocation7 + $0x28] sm:$0xff]   ;;  %v634_v38 = vld [vmem:[#allocation5 + $0xb0] ss:$8 sps:$4 sm:$0xff]   ;;  %v638_v41 = vld [vmem:[#allocation5 + $0xd4] ss:$8 sps:$4 sm:$0xff]  }
  0x44   :  { %v635_v39 = vld [vmem:[#allocation5 + $0xc4] ss:$8 sps:$4 sm:$0xff]   ;;  %v637_v40 = vld [vmem:[#allocation5 + $0xc0] ss:$8 sps:$4 sm:$0xff]   ;;  %v640_v42 = vld [vmem:[#allocation5 + $0xd0] ss:$8 sps:$4 sm:$0xff]  }
  0x45   :  { %278 = vmatpush1.bf16.msra.mxu0 %v610_v7  ;;  %v641_v43 = vld [vmem:[#allocation5 + $0xe4] ss:$8 sps:$4 sm:$0xff]   ;;  %v643_v44 = vld [vmem:[#allocation5 + $0xe0] ss:$8 sps:$4 sm:$0xff]   ;;  %v644_v45 = vld [vmem:[#allocation5 + $0xf4] ss:$8 sps:$4 sm:$0xff]  }
  0x46   :  { %279 = vmatprep.subr.bf16.mxu0 %v611_v8  ;;  %574 = vmatpush3.bf16.msra.mxu1 %v653_v25  ;;  %v646_v46 = vld [vmem:[#allocation5 + $0xf0] ss:$8 sps:$4 sm:$0xff]  }
  0x47   :  { %575 = vmatprep.subr.bf16.mxu1 %v654_v26  ;;  %v660_v48 = vld [vmem:[#allocation7 + $0x70] sm:$0xff]   ;;  %v662_v50 = vld [vmem:[#allocation7 + $0x78] sm:$0xff]  }
  0x48   :  { %v661_v49 = vld [vmem:[#allocation7 + $0x30] sm:$0xff]   ;;  %v663_v51 = vld [vmem:[#allocation7 + $0x38] sm:$0xff]  }
  0x49   :  { %280 = vmatpush1.bf16.msra.mxu0 %v613_v9  ;;  %v99_v55 = vld [vmem:[%s862_s2] sm:$0x3]  ;;  %s769_s2 = smov [#allocation8]  }
  0x4a   :  { %281 = vmatprep.subr.bf16.mxu0 %v614_v10  ;;  %576 = vmatpush3.bf16.msra.mxu1 %v655_v30  ;;  %v104_v57 = vrot.slane %v99_v55, %v103_v54  ;;  %v108_v58 = vrot.slane %v99_v55, %v107_v56  ;;  %v552_v7 = vld [vmem:[%s864_s4] ss:$0 sm:$0xff]  ;;  %s510_s9 = sshll.u32 %s769_s2, 4  ;;  %s511_s9 = int_to_ptr.vmem [resolvable:$true] %s510_s9 }
  0x4b   :  { %577 = vmatprep.subr.bf16.mxu1 %v656_v31  ;;  %s734_s4 = scalar_lea.vmem %s511_s9, 64  ;;  %p739_p11 = scmp.lt.s32.totalorder %s511_s9, %s511_s9 }
  0x4c   :  { %p735_p10 = scmp.ne.s32.totalorder %s511_s9, %s734_s4  ;;  %p740_p12 = scmp.lt.s32.totalorder %s734_s4, %s734_s4 }
  0x4d   :  { %282 = vmatpush1.bf16.msra.mxu0 %v616_v11 }
  0x4e   :  { %283 = vmatprep.subr.bf16.mxu0 %v617_v12  ;;  %578 = vmatpush3.bf16.msra.mxu1 %v657_v33  ;;  %p741_p13 = por %p740_p12, %p739_p11 }
  0x4f   :  { %579 = vmatprep.subr.bf16.mxu1 %v658_v34 }
  0x50   :  { %p742_p0 = pnand %p741_p13, %p735_p10 }
  0x51   :  { %284 = vmatpush1.bf16.msra.mxu0 %v619_v13 }
  0x52   :  { %285 = vmatprep.subr.bf16.mxu0 %v620_v15  ;;  %580 = vmatpush3.bf16.msra.mxu1 %v659_v37 }
  0x53   :  { %581 = vmatprep.subr.bf16.mxu1 %v660_v48 }
  0x55   :  { %286 = vmatpush1.bf16.msra.mxu0 %v622_v23 }
  0x56   :  { %287 = vmatprep.subr.bf16.mxu0 %v623_v24  ;;  %582 = vmatpush3.bf16.msra.mxu1 %v661_v49 }
  0x57   :  { %583 = vmatprep.subr.bf16.mxu1 %v662_v50 }
  0x59   :  { %288 = vmatpush1.bf16.msra.mxu0 %v625_v27 }
  0x5a   :  { %289 = vmatprep.subr.bf16.mxu0 %v626_v28  ;;  %584 = vmatpush3.bf16.msra.mxu1 %v663_v51 }
  0x5d   :  { %290 = vmatpush1.bf16.msra.mxu0 %v628_v29 }
  0x5e   :  { %291 = vmatprep.subr.bf16.mxu0 %v629_v32 }
  0x61   :  { %292 = vmatpush1.bf16.msra.mxu0 %v631_v35 }
  0x62   :  { %293 = vmatprep.subr.bf16.mxu0 %v632_v36 }
  0x65   :  { %294 = vmatpush1.bf16.msra.mxu0 %v634_v38 }
  0x66   :  { %295 = vmatprep.subr.bf16.mxu0 %v635_v39 }
  0x69   :  { %296 = vmatpush1.bf16.msra.mxu0 %v637_v40 }
  0x6a   :  { %297 = vmatprep.subr.bf16.mxu0 %v638_v41 }
  0x6d   :  { %298 = vmatpush1.bf16.msra.mxu0 %v640_v42 }
  0x6e   :  { %299 = vmatprep.subr.bf16.mxu0 %v641_v43 }
  0x71   :  { %300 = vmatpush1.bf16.msra.mxu0 %v643_v44 }
  0x72   :  { %301 = vmatprep.subr.bf16.mxu0 %v644_v45 }
  0x75   :  { %302 = vmatpush1.bf16.msra.mxu0 %v646_v46 }
  0x78   :  { %304 = vmatmul.mubr.bf16.vlgmr.msra.gmra.mrb[0].mxu0 %v65_v47 }
 0x14b   :  { %v305_v59 = vpop.f32.mrb[0].mxu0 }
 0x14c   :  { %v306_v60 = vadd.f32 %v305_v59, %v104_v57  ;;  %v307_v61 = vpop.f32.mrb[1].mxu0 }
 0x14d   :  { %v308_v62 = vadd.f32 %v307_v61, %v108_v58  ;;  %v309_v63 = vpop.f32.mrb[2].mxu0 }
 0x14e   :  { %v312_v0 = vmax.f32 %v306_v60, 0.0  ;;  %v310_v1 = vpop.f32.mrb[3].mxu0 }
 0x14f   :  { %v313_v2 = vmax.f32 %v308_v62, 0.0 }
 0x150   :  { %v314_v4 = vpack.c.bf16 %v312_v0, %v312_v0 }
 0x151   :  { %v315_v3 = vpack.c.bf16 %v313_v2, %v313_v2 }
 0x153   :  { %483 = vmatprep.mubr.bf16.mxu1 %v315_v3 }
 0x154   :  { %484 = vmatmul.mubr.bf16.vlgmr.msra.gmra.mrb[0].mxu1 %v314_v4 }
 0x227   :  { %v585_v5 = vpop.f32.mrb[0].mxu1 }
 0x228   :  { %v586_v6 = vpop.f32.mrb[1].mxu1 }
 0x229   :  { %v587_v8 = vadd.f32 %v586_v6, %v585_v5  ;;  %v588_v9 = vpop.f32.mrb[2].mxu1 }
 0x22a   :  { %v589_v10 = vpop.f32.mrb[3].mxu1 }
 0x22b   :  { %v486_v11 = vadd.f32 %v587_v8, %v552_v7 }
 0x22d   :  { %v492_v12 = vsel %vm491_vm0, %v486_v11, -inf }
 0x22e   :  { %493 = vmax.xlane.f32.xlu0 %v492_v12 }
 0x2bb   :  { %v494_v13 = vpop.xlane.xlu0 %493 }
 0x2bc   :  { %v495_v14 = vsub.f32 %v486_v11, %v494_v13 }
 0x2be   :  { %v496_v15 = vmul.f32 1.442695, %v495_v14 }
 0x2c0   :  { %664 = vpow2.f32 %v496_v15 }
 0x2ca   :  { %v665_v16 = vpop.eup %664 }
 0x2cb   :  { %v498_v17 = vsel %vm491_vm0, %v665_v16, 0.0 }
 0x2cc   :  { %499 = vadd.xlane.f32.xlu0 %v498_v17 }
 0x359   :  { %v500_v18 = vpop.xlane.xlu0 %499 }
 0x35a   :  { %666 = vrcp.f32 %v500_v18 }
 0x364   :  { %v667_v19 = vpop.eup %666 }
 0x365   :  { %v502_v20 = vmul.f32 %v667_v19, %v665_v16 }
 0x367   :  { %503 = vst [vmem:[#allocation8] sm:$0xf] %v502_v20 }
 0x368   :  { %745 = shalt.err (!%p742_p0)
}
 0x369   :  { %s746_s12 = scalar_lea.hbm %s865_s5, 64 }
 0x36a   :  { %p747_p1 = scmp.ne.s32.totalorder %s865_s5, %s746_s12  ;;  %p750_p2 = scmp.lt.u32.totalorder %s746_s12, %s865_s5 }
 0x36c   :  { %p752_p3 = pnand %p750_p2, %p747_p1 }
 0x36e   :  { %755 = shalt.err (!%p752_p3)
}
 0x36f   :  { %513 = dma.vmem_to_hbm [thread:$0]  %s511_s9, 64, %s865_s5, [#allocation4]  }
 0x370   :  { %760 = dma.done.wait [#allocation4], 64  }
 0x371   :  { %761 = vsyncadd [#allocation4], 4294967232 }
 0x372   :  { %517 = vsyncpa [#allocation3], 1 }
 0x373   :  { %518 = vsyncpa [#allocation6], 1 }
 0x374   :  { %519 = vsyncpa [#allocation4], 1 }

</bundles_post_ra>
